<compile_context>
chip_gen: v5e
topology: v5e:2x2
jax: 0.10.0
libtpu: 0.0.40
codegen_flags: <defaults>
</compile_context>

<pallas_src>
import math

import jax
import jax.numpy as jnp
from jax.experimental import pallas as pl
from jax.experimental.pallas import tpu as pltpu


def _round_up(x, m):
    return ((x + m - 1) // m) * m


def _siren_kernel(x_ref, w_ref, b_ref, o_ref):
    # w_ref is pre-transposed (dim_in, TN) and pre-scaled by w0; b_ref pre-scaled.
    acc = jnp.dot(x_ref[...], w_ref[...], preferred_element_type=jnp.float32)
    acc = acc + b_ref[...].astype(jnp.float32)   # broadcast (1, TN) over rows
    o_ref[...] = jnp.sin(acc).astype(o_ref.dtype)


def siren_forward(x, weight, bias, w0=1.0):
    """Siren layer: sin(w0 * (x @ weight.T + bias)).

    x: (B, dim_in), weight: (dim_out, dim_in) (PyTorch F.linear layout),
    bias: (dim_out,). Returns (B, dim_out) in x.dtype.
    """
    B, dim_in = x.shape
    dim_out = weight.shape[0]

    # Fold w0 into the (small) params once; pre-transpose for (M,K)x(K,N).
    w_t = (weight * w0).T                       # (dim_in, dim_out)
    b2 = (bias * w0).reshape(1, dim_out)

    # Tile sizes: TM multiple of 8, TN multiple of 128 (lane-dense stores).
    TM = min(1024, _round_up(B, 8))
    TN = min(512, _round_up(dim_out, 128))

    Bp = _round_up(B, TM)
    Np = _round_up(dim_out, TN)

    if Bp != B:
        x = jnp.pad(x, ((0, Bp - B), (0, 0)))
    if Np != dim_out:
        w_t = jnp.pad(w_t, ((0, 0), (0, Np - dim_out)))
        b2 = jnp.pad(b2, ((0, 0), (0, Np - dim_out)))

    # Grid: dim_out tiles outer, batch tiles inner -> weight/bias blocks stay
    # resident across the (typically huge) batch axis.
    grid = (Np // TN, Bp // TM)

    itemsize = jnp.dtype(x.dtype).itemsize
    cost = pl.CostEstimate(
        flops=2 * B * dim_in * dim_out,
        transcendentals=B * dim_out,
        bytes_accessed=itemsize
        * (B * dim_in + dim_in * dim_out + dim_out + B * dim_out),
    )

    out = pl.pallas_call(
        _siren_kernel,
        out_shape=jax.ShapeDtypeStruct((Bp, Np), x.dtype),
        grid_spec=pltpu.PrefetchScalarGridSpec(
            num_scalar_prefetch=0,
            grid=grid,
            in_specs=[
                pl.BlockSpec((TM, dim_in), lambda j, i: (i, 0)),
                pl.BlockSpec((dim_in, TN), lambda j, i: (0, j)),
                pl.BlockSpec((1, TN), lambda j, i: (0, j)),
            ],
            out_specs=pl.BlockSpec((TM, TN), lambda j, i: (i, j)),
        ),
        compiler_params=pltpu.CompilerParams(
            dimension_semantics=("parallel", "parallel"),
            vmem_limit_bytes=48 * 1024 * 1024,
        ),
        cost_estimate=cost,
    )(x, w_t, b2)

    if Bp != B or Np != dim_out:
        out = out[:B, :dim_out]
    return out


def make_siren_params(key, dim_in, dim_out, w0=1.0, c=6.0, is_first=False):
    """Deterministic init matching Siren.init_: U(-w_std, w_std)."""
    w_std = (1.0 / dim_in) if is_first else (math.sqrt(c / dim_in) / w0)
    kw, kb = jax.random.split(key)
    weight = jax.random.uniform(
        kw, (dim_out, dim_in), minval=-w_std, maxval=w_std, dtype=jnp.float32
    )
    bias = jax.random.uniform(
        kb, (dim_out,), minval=-w_std, maxval=w_std, dtype=jnp.float32
    )
    return weight, bias


# TODO(synk): the PyTorch module accepts an arbitrary `activation` override;
# only the default Sine activation is implemented in the kernel.

if __name__ == "__main__":
    key = jax.random.PRNGKey(0)
    kx, kp1, kp2 = jax.random.split(key, 3)

    batch, dim_in, dim_out = 8, 32, 32
    x = jax.random.normal(kx, (batch, dim_in), dtype=jnp.float32)

    # Case 1: w0 = 1.0 (exact match with reference).
    w0 = 1.0
    weight, bias = make_siren_params(kp1, dim_in, dim_out, w0=w0, is_first=True)
    out = jax.block_until_ready(siren_forward(x, weight, bias, w0=w0))
    ref = jnp.sin(w0 * (x @ weight.T + bias))
    assert out.shape == (batch, dim_out)
    assert jnp.allclose(out, ref, atol=1e-5, rtol=1e-5)

    # Case 2: typical first-layer w0 = 30.0 (exercises the w0 fold + padding).
    w0 = 30.0
    weight, bias = make_siren_params(kp2, dim_in, dim_out, w0=w0, is_first=True)
    out = jax.block_until_ready(siren_forward(x, weight, bias, w0=w0))
    ref = jnp.sin(w0 * (x @ weight.T + bias))
    assert out.shape == (batch, dim_out)
    assert jnp.allclose(out, ref, atol=1e-4, rtol=1e-4)

    print("KERNEL_OK")
</pallas_src>

<mosaic_0001>
module attributes {stable_mosaic.version = 11 : i64} {
  func.func @_siren_kernel(%arg0: i32, %arg1: i32, %arg2: memref<8x32xf32, #tpu.memory_space<vmem>>, %arg3: memref<32x128xf32, #tpu.memory_space<vmem>>, %arg4: memref<1x128xf32, #tpu.memory_space<vmem>>, %arg5: memref<8x128xf32, #tpu.memory_space<vmem>>) attributes {dimension_semantics = [#tpu.dimension_semantics<parallel>, #tpu.dimension_semantics<parallel>], iteration_bounds = array<i64: 1, 1>, scalar_prefetch = 0 : i64, scratch_operands = 0 : i64, tpu.core_type = #tpu.core_type<tc>, window_params = [{transform_indices = @transform_0, window_bounds = array<i64: 8, 32>}, {transform_indices = @transform_1, window_bounds = array<i64: 32, 128>}, {transform_indices = @transform_2, window_bounds = array<i64: 1, 128>}, {transform_indices = @transform_3, window_bounds = array<i64: 8, 128>}]} {
    %c0 = arith.constant 0 : index
    %c0_0 = arith.constant 0 : index
    %0 = vector.load %arg2[%c0, %c0_0] : memref<8x32xf32, #tpu.memory_space<vmem>>, vector<8x32xf32>
    %c0_1 = arith.constant 0 : index
    %c0_2 = arith.constant 0 : index
    %1 = vector.load %arg3[%c0_1, %c0_2] : memref<32x128xf32, #tpu.memory_space<vmem>>, vector<32x128xf32>
    %cst = arith.constant dense<0.000000e+00> : vector<8x128xf32>
    %2 = tpu.matmul %0, %1, %cst {dimension_numbers = #tpu.dot_dimension_numbers<[1], [0], [0], [1], [0, 0, 1, 1], [], []>} : vector<8x32xf32>, vector<32x128xf32>, vector<8x128xf32> -> vector<8x128xf32>
    %c0_3 = arith.constant 0 : index
    %c0_4 = arith.constant 0 : index
    %3 = vector.load %arg4[%c0_3, %c0_4] : memref<1x128xf32, #tpu.memory_space<vmem>>, vector<1x128xf32>
    %4 = vector.broadcast %3 : vector<1x128xf32> to vector<8x128xf32>
    %5 = arith.addf %2, %4 : vector<8x128xf32>
    %6 = math.sin %5 : vector<8x128xf32>
    %c0_5 = arith.constant 0 : index
    %c0_6 = arith.constant 0 : index
    %7 = vector.load %arg5[%c0_5, %c0_6] : memref<8x128xf32, #tpu.memory_space<vmem>>, vector<8x128xf32>
    tpu.vector_store %arg5[%c0_5, %c0_6], %6 {strides = array<i32>} : memref<8x128xf32, #tpu.memory_space<vmem>>, vector<8x128xf32>,
    return
  }
  func.func @transform_0(%arg0: i32, %arg1: i32) -> (i32, i32) {
    %c0_i32 = arith.constant 0 : i32
    %c0_i32_0 = arith.constant 0 : i32
    return %arg1, %c0_i32 : i32, i32
  }
  func.func @transform_1(%arg0: i32, %arg1: i32) -> (i32, i32) {
    %c0_i32 = arith.constant 0 : i32
    %c0_i32_0 = arith.constant 0 : i32
    return %c0_i32, %arg0 : i32, i32
  }
  func.func @transform_2(%arg0: i32, %arg1: i32) -> (i32, i32) {
    %c0_i32 = arith.constant 0 : i32
    %c0_i32_0 = arith.constant 0 : i32
    return %c0_i32, %arg0 : i32, i32
  }
  func.func @transform_3(%arg0: i32, %arg1: i32) -> (i32, i32) {
    %c0_i32 = arith.constant 0 : i32
    return %arg1, %arg0 : i32, i32
  }
}

</mosaic_0001>

<bundles_post_ra>
// kernel: tpu_custom_call.1
= control target key start
LH: loop header
LB: loop body
LE: loop exit
PB: predicated region body
PF: predicated region fallthrough
CT: control target
= control target key end

     0   :  { %8 = vsyncpa [#allocation3], 0  ;;  %s447_s0 = inlined_call_operand.hbm [shape: f32[8,32], index: 0, kind: input, shape index: {}]   ;;  %s448_s1 = inlined_call_operand.hbm [shape: f32[32,128], index: 1, kind: input, shape index: {}]   ;;  %s449_s2 = inlined_call_operand.vmem [shape: f32[1,128], index: 2, kind: input, shape index: {}]   ;;  %s450_s3 = inlined_call_operand.hbm [shape: f32[8,128], index: 3, kind: output, shape index: {}]  }
   0x1   :  { %9 = vsyncpa [#allocation6], 0 }
   0x2   :  { %10 = vsyncpa [#allocation4], 0  ;;  %s16_s14 = sshll.u32 %s447_s0, 4  ;;  %s347_s15 = smov [#allocation2]   ;;  %s17_s14 = int_to_ptr.hbm [resolvable:$true] %s16_s14 }
   0x3   :  { %s18_s16 = sshll.u32 %s347_s15, 4  ;;  %s26_s19 = sshll.u32 %s448_s1, 4  ;;  %s19_s16 = int_to_ptr.vmem [resolvable:$true] %s18_s16  ;;  %s27_s19 = int_to_ptr.hbm [resolvable:$true] %s26_s19 }
   0x4   :  { %21 = dma.hbm_to_vmem [thread:$0]  %s17_s14, 128, %s19_s16, [#allocation3]  }
   0x5   :  { %s348_s20 = smov [#allocation5]   ;;  %s349_s22 = smov 128  }
   0x6   :  { %s28_s21 = sshll.u32 %s348_s20, 4  ;;  %s350_s23 = smov 8   ;;  %s29_s21 = int_to_ptr.vmem [resolvable:$true] %s28_s21 }
   0x7   :  { %34 = dma.hbm_to_vmem [thread:$0]  %s27_s19, 512, %s29_s21, [#allocation6], %s349_s22, %s349_s22, %s350_s23  }
   0x8   :  { %341 = dma.done.wait [#allocation3], 128  }
   0x9   :  { %342 = vsyncadd [#allocation3], 4294967168 }
   0xa   :  { %343 = dma.done.wait [#allocation6], 512  }
   0xb   :  { %344 = vsyncadd [#allocation6], 4294966784  ;;  %v49_v0 = vld [vmem:[#allocation5 + $0x18] sm:$0xff]  ;;  %v48_v1 = vld [vmem:[#allocation5 + $0x10] sm:$0xff]  ;;  %vm54_vm0 = vcmask 261120   ;;  %s241_s27 = sshll.u32 %s450_s3, 4  ;;  %s242_s27 = int_to_ptr.hbm [resolvable:$true] %s241_s27 }
   0xc   :  { %70 = vmatpush.msra.mxu0 %v49_v0  ;;  %v47_v2 = vld [vmem:[#allocation5 + $0x8] sm:$0xff]  ;;  %v46_v3 = vld [vmem:[#allocation5] sm:$0xff]  ;;  %v45_v4 = vld [vmem:[#allocation2] sm:$0xff]  ;;  %v351_v19 = vmov 683565275  }
   0xd   :  { %v268_v5 = vld [vmem:[%s449_s2] ss:$0 sm:$0xff]  ;;  %v352_v21 = vmov 2475754826   ;;  %v353_v24 = vmov 2131351028  }
   0xe   :  { %71 = vmatpush.msra.mxu0 %v48_v1  ;;  %v354_v27 = vmov 2102212464   ;;  %v355_v30 = vmov 920167782   ;;  %v356_v33 = vmov 1326507024  }
   0xf   :  { %s358_s2 = smov [#allocation7]  }
  0x10   :  { %72 = vmatpush.msra.mxu0 %v47_v2  ;;  %s239_s24 = sshll.u32 %s358_s2, 4  ;;  %s240_s24 = int_to_ptr.vmem [resolvable:$true] %s239_s24 }
  0x12   :  { %73 = vmatpush.msra.mxu0 %v46_v3  ;;  %v357_v3 = vmov 0  }
  0x13   :  { %252 = vmatmul.msk.f32.vlgmr.msra.gmra.mxu0 %vm54_vm0, %v45_v4 }
  0x90   :  { %v75_v6 = vpop.f32.mrf.mxu0 }
  0x91   :  { %v388_v7 = vadd.f32 %v268_v5, %v75_v6 }
  0x93   :  { %v81_v8 = vand.u32 2139095040, %v388_v7  ;;  %v78_v11 = vand.u32 2147483647, %v388_v7  ;;  %vm80_vm13 = vcmp.lt.s32.totalorder %v388_v7, 0 }
  0x95   :  { %v82_v9 = vshrl.u32 %v81_v8, 23  ;;  %v85_v13 = vand.u32 8388607, %v78_v11  ;;  %vm79_vm14 = vcmp.le.f32.partialorder %v78_v11, 0.7853982 }
  0x97   :  { %v253_v10 = vadd.s32 4294967169, %v82_v9  ;;  %v86_v17 = vor.u32 8388608, %v85_v13 }
  0x99   :  { %v88_v12 = vadd.s32 1, %v253_v10  ;;  %v405_v40 = vshll.u32 %v86_v17, 8 }
  0x9b   :  { %vm89_vm1 = vcmp.gt.s32.totalorder %v88_v12, 0  ;;  %v127_v49 = vand.u32 65535, %v405_v40  ;;  %v128_v50 = vshrl.u32 %v405_v40, 16 }
  0x9c   :  { %v90_v14 = vsel %vm89_vm1, %v88_v12, 0 }
  0x9d   :  { %v92_v15 = vand.u32 31, %v90_v14  ;;  %v396_v18 = vshrl.u32 %v90_v14, 5 }
  0x9f   :  { %v394_v16 = vsub.s32 32, %v92_v15  ;;  %v95_v20 = vshll.u32 %v351_v19, %v92_v15  ;;  %v98_v22 = vshll.u32 %v352_v21, %v92_v15  ;;  %v101_v26 = vshll.u32 %v353_v24, %v92_v15 }
  0xa0   :  { %v104_v29 = vshll.u32 %v354_v27, %v92_v15  ;;  %v107_v32 = vshll.u32 %v355_v30, %v92_v15  ;;  %vm110_vm2 = vcmp.lt.s32.totalorder %v396_v18, 1  ;;  %vm113_vm3 = vcmp.lt.s32.totalorder %v396_v18, 4 }
  0xa1   :  { %v96_v23 = vshrl.u32 %v352_v21, %v394_v16  ;;  %v99_v25 = vshrl.u32 %v353_v24, %v394_v16  ;;  %v102_v28 = vshrl.u32 %v354_v27, %v394_v16  ;;  %v105_v31 = vshrl.u32 %v355_v30, %v394_v16 }
  0xa2   :  { %v108_v34 = vshrl.u32 %v356_v33, %v394_v16  ;;  %vm112_vm4 = vcmp.lt.s32.totalorder %v396_v18, 3  ;;  %vm111_vm5 = vcmp.lt.s32.totalorder %v396_v18, 2  ;;  %v94_v14 = vshrl.u32 %v351_v19, %v394_v16 }
  0xa3   :  { %v97_v35 = vor.u32 %v96_v23, %v95_v20  ;;  %v100_v36 = vor.u32 %v99_v25, %v98_v22  ;;  %v103_v37 = vor.u32 %v102_v28, %v101_v26  ;;  %v106_v38 = vor.u32 %v105_v31, %v104_v29 }
  0xa4   :  { %v109_v39 = vor.u32 %v108_v34, %v107_v32 }
  0xa5   :  { %v118_v41 = vsel %vm110_vm2, %v97_v35, %v100_v36  ;;  %v122_v42 = vsel %vm110_vm2, %v100_v36, %v103_v37  ;;  %v119_v43 = vsel %vm113_vm3, %v106_v38, 920167782  ;;  %v115_v10 = vsel %vm113_vm3, %v103_v37, 2102212464 }
  0xa6   :  { %v123_v44 = vsel %vm113_vm3, %v109_v39, 1326507024  ;;  %v120_v45 = vsel %vm112_vm4, %v103_v37, %v119_v43  ;;  %v114_v23 = vsel %vm110_vm2, %v94_v14, %v97_v35  ;;  %v116_v24 = vsel %vm112_vm4, %v100_v36, %v115_v10 }
  0xa7   :  { %v124_v46 = vsel %vm112_vm4, %v106_v38, %v123_v44  ;;  %v121_v47 = vsel %vm111_vm5, %v118_v41, %v120_v45  ;;  %v117_v16 = vsel %vm111_vm5, %v114_v23, %v116_v24  ;;  %vm221_vm2 = vweird.f32 %v388_v7 }
  0xa8   :  { %v125_v48 = vsel %vm111_vm5, %v122_v42, %v124_v46  ;;  %v151_v53 = vand.u32 65535, %v121_v47  ;;  %v152_v54 = vshrl.u32 %v121_v47, 16  ;;  %v171_v32 = vmul.u32 %v405_v40, %v117_v16 }
  0xa9   :  { %v129_v51 = vand.u32 65535, %v125_v48  ;;  %v130_v52 = vshrl.u32 %v125_v48, 16 }
  0xaa   :  { %v154_v57 = vmul.u32 %v152_v54, %v127_v49  ;;  %v155_v58 = vmul.u32 %v151_v53, %v128_v50  ;;  %v153_v62 = vmul.u32 %v151_v53, %v127_v49  ;;  %v156_v2 = vmul.u32 %v152_v54, %v128_v50 }
  0xab   :  { %v132_v55 = vmul.u32 %v130_v52, %v127_v49  ;;  %v133_v56 = vmul.u32 %v129_v51, %v128_v50  ;;  %v131_v59 = vmul.u32 %v129_v51, %v127_v49  ;;  %v134_v61 = vmul.u32 %v130_v52, %v128_v50 }
  0xac   :  { %v157_v63 = vshll.u32 %v154_v57, 16  ;;  %v159_v5 = vshll.u32 %v155_v58, 16  ;;  %v158_v21 = vshrl.u32 %v154_v57, 16  ;;  %v160_v27 = vshrl.u32 %v155_v58, 16 }
  0xad   :  { %v135_v60 = vshll.u32 %v132_v55, 16  ;;  %v137_v0 = vshll.u32 %v133_v56, 16  ;;  %v136_v15 = vshrl.u32 %v132_v55, 16  ;;  %v138_v25 = vshrl.u32 %v133_v56, 16 }
  0xae   :  { %vm161_vm7 = vc.u32 %v153_v62, %v157_v63  ;;  %v163_v6 = vadd.s32 %v157_v63, %v153_v62 }
  0xaf   :  { %vm139_vm6 = vc.u32 %v131_v59, %v135_v60  ;;  %v141_v1 = vadd.s32 %v135_v60, %v131_v59  ;;  %v162_v9 = vsel %vm161_vm7, 1, %v357_v3 }
  0xb0   :  { %v140_v4 = vsel %vm139_vm6, 1, %v357_v3  ;;  %v164_v13 = vadd.s32 %v162_v9, %v156_v2  ;;  %vm165_vm9 = vc.u32 %v163_v6, %v159_v5  ;;  %v167_v30 = vadd.s32 %v163_v6, %v159_v5 }
  0xb1   :  { %v142_v8 = vadd.s32 %v140_v4, %v134_v61  ;;  %vm143_vm8 = vc.u32 %v141_v1, %v137_v0  ;;  %v166_v20 = vsel %vm165_vm9, 1, %v357_v3 }
  0xb2   :  { %v144_v12 = vsel %vm143_vm8, 1, %v357_v3  ;;  %v168_v22 = vadd.s32 %v166_v20, %v164_v13 }
  0xb3   :  { %v146_v17 = vadd.s32 %v144_v12, %v142_v8 }
  0xb4   :  { %v169_v28 = vadd.s32 %v168_v22, %v158_v21 }
  0xb5   :  { %v147_v26 = vadd.s32 %v146_v17, %v136_v15 }
  0xb6   :  { %v170_v19 = vadd.s32 %v169_v28, %v160_v27 }
  0xb7   :  { %v148_v29 = vadd.s32 %v147_v26, %v138_v25 }
  0xb8   :  { %v174_v31 = vadd.s32 1, %v170_v19 }
  0xb9   :  { %vm173_vm10 = vc.u32 %v148_v29, %v167_v30  ;;  %v172_v18 = vadd.s32 %v167_v30, %v148_v29 }
  0xba   :  { %v175_v33 = vsel %vm173_vm10, %v174_v31, %v170_v19 }
  0xbb   :  { %v176_v34 = vadd.s32 %v175_v33, %v171_v32 }
  0xbd   :  { %v177_v35 = vadd.s32 536870912, %v176_v34 }
  0xbf   :  { %v178_v37 = vshrl.u32 %v177_v35, 30 }
  0xc1   :  { %v179_v38 = vshll.u32 %v178_v37, 30  ;;  %v202_v58 = vsub.s32 4, %v178_v37 }
  0xc3   :  { %v180_v36 = vsub.s32 %v176_v34, %v179_v38  ;;  %v203_v62 = vsel %vm80_vm13, %v202_v58, %v178_v37 }
  0xc4   :  { %v205_v1 = vsel %vm79_vm14, 0, %v203_v62 }
  0xc5   :  { %vm181_vm11 = vcmp.lt.s32.totalorder %v180_v36, 0  ;;  %v182_v39 = vsub.s32 0, %v180_v36  ;;  %v222_v6 = vadd.s32 3, %v205_v1 }
  0xc7   :  { %v183_v41 = vsel %vm181_vm11, %v182_v39, %v180_v36  ;;  %v223_v12 = vand.u32 3, %v222_v6 }
  0xc8   :  { %v184_v42 = vclz %v183_v41 }
  0xc9   :  { %vm225_vm15 = vcmp.eq.s32.totalorder %v223_v12, 0  ;;  %vm228_vm0 = vcmp.eq.s32.totalorder %v223_v12, 2  ;;  %vm224_vm1 = vcmp.lt.s32.totalorder %v223_v12, 2 }
  0xca   :  { %v254_v43 = vadd.s32 4294967294, %v184_v42 }
  0xcc   :  { %vm255_vm12 = vcmp.lt.s32.totalorder %v254_v43, 0 }
  0xcd   :  { %v187_v44 = vsel %vm255_vm12, 0, %v254_v43 }
  0xce   :  { %v188_v45 = vsub.s32 32, %v187_v44  ;;  %v192_v46 = vsub.s32 4294967266, %v187_v44  ;;  %v189_v47 = vshll.u32 %v180_v36, %v187_v44 }
  0xd0   :  { %v190_v48 = vshrl.u32 %v172_v18, %v188_v45  ;;  %v193_v49 = vadd.s32 127, %v192_v46 }
  0xd2   :  { %v191_v40 = vor.u32 %v190_v48, %v189_v47  ;;  %v194_v50 = vshll.u32 %v193_v49, 23 }
  0xd4   :  { %v195_v51 = vor.u32 4788187, %v194_v50  ;;  %v198_v53 = vcvt.s32.f32 %v191_v40 }
  0xd6   :  { %v196_v52 = vand.u32 2147483647, %v195_v51 }
  0xd8   :  { %v199_v54 = vmul.f32 %v198_v53, %v196_v52 }
  0xda   :  { %v200_v55 = vxor.u32 2147483648, %v199_v54 }
  0xdc   :  { %v201_v56 = vsel %vm80_vm13, %v200_v55, %v199_v54 }
  0xdd   :  { %v204_v57 = vsel %vm79_vm14, %v388_v7, %v201_v56 }
  0xde   :  { %v206_v59 = vmul.f32 %v204_v57, %v204_v57 }
  0xe0   :  { %v207_v60 = vmul.f32 -0.001358992, %v206_v59  ;;  %v214_v61 = vmul.f32 -0.00019511016, %v206_v59 }
  0xe2   :  { %v208_v63 = vadd.f32 0.041655596, %v207_v60  ;;  %v215_v0 = vadd.f32 0.008332121, %v214_v61 }
  0xe4   :  { %v209_v2 = vmul.f32 %v208_v63, %v206_v59  ;;  %v216_v3 = vmul.f32 %v215_v0, %v206_v59 }
  0xe6   :  { %v210_v4 = vadd.f32 -0.4999988, %v209_v2  ;;  %v217_v5 = vadd.f32 -0.16666654, %v216_v3 }
  0xe8   :  { %v211_v8 = vmul.f32 %v210_v4, %v206_v59  ;;  %v218_v9 = vmul.f32 %v217_v5, %v206_v59 }
  0xea   :  { %v212_v10 = vadd.f32 1.0, %v211_v8  ;;  %v219_v11 = vadd.f32 1.0, %v218_v9 }
  0xec   :  { %v220_v13 = vmul.f32 %v219_v11, %v204_v57  ;;  %v229_v14 = vxor.u32 2147483648, %v212_v10 }
  0xee   :  { %v226_v15 = vxor.u32 2147483648, %v220_v13  ;;  %v230_v20 = vsel %vm228_vm0, %v229_v14, %v220_v13 }
  0xf0   :  { %v227_v17 = vsel %vm225_vm15, %v212_v10, %v226_v15 }
  0xf1   :  { %v231_v21 = vsel %vm224_vm1, %v227_v17, %v230_v20 }
  0xf2   :  { %v232_v22 = vsel %vm221_vm2, nan, %v231_v21 }
  0xf3   :  { %233 = vst [vmem:[#allocation7] sm:$0xff] %v232_v22 }
  0xf4   :  { %244 = dma.vmem_to_hbm [thread:$0]  %s240_s24, 128, %s242_s27, [#allocation4]  }
  0xf5   :  { %345 = dma.done.wait [#allocation4], 128  }
  0xf6   :  { %346 = vsyncadd [#allocation4], 4294967168 }
  0xf7   :  { %249 = vsyncpa [#allocation3], 1 }
  0xf8   :  { %250 = vsyncpa [#allocation6], 1 }
  0xf9   :  { %251 = vsyncpa [#allocation4], 1 }

</bundles_post_ra>
